<compile_context>
chip_gen: v5e
topology: v5e:2x2
jax: 0.10.0
libtpu: 0.0.40
codegen_flags: <defaults>
</compile_context>

<pallas_src>
import functools

import jax
import jax.numpy as jnp
from jax import lax
from jax.experimental import pallas as pl
from jax.experimental.pallas import tpu as pltpu

_BIG = 1.0e12


def _default_num_partials() -> int:
    """1 on single-TensorCore chips (v5e/v6e), 2 where a parallel axis helps."""
    try:
        kind = jax.devices()[0].device_kind.lower()
    except Exception:
        return 1
    single_tc = any(t in kind for t in ("v5 lite", "v5e", "v5litepod", "v6 lite", "v6e"))
    return 1 if single_tc else 2


def _mlcce_kernel(pred_ref, true_ref, out_ref, *, tb, steps, batch):
    p = pl.program_id(0)   # parallel partition (one partial sum per partition)
    s = pl.program_id(1)   # reduction steps within the partition

    @pl.when(s == 0)
    def _init():
        out_ref[...] = jnp.zeros_like(out_ref)

    tile_idx = p * steps + s

    # Raw-dtype compare (no f32 cast of the labels); only the logits get cast.
    is_pos = true_ref[...] != 0                                   # (tb, C) bool
    y_pred = pred_ref[...].astype(jnp.float32)                    # (tb, C) f32

    # Binary-label collapse of (1-2y)*pred with 1e12 masking (see header).
    y_neg = jnp.where(is_pos, -_BIG, y_pred)                      # keep negatives
    y_pos = jnp.where(is_pos, -y_pred, -_BIG)                     # keep positives

    def lse_with_zero(x):
        # logsumexp over last dim with an implicit extra 0 logit, stably:
        #   m = max(max(x), 0);  m + log(sum(exp(x-m)) + exp(-m))
        # A fully-masked row (all -_BIG) yields exactly 0.
        m = jnp.maximum(jnp.max(x, axis=-1, keepdims=True), 0.0)
        t = jnp.sum(jnp.exp(x - m), axis=-1, keepdims=True) + jnp.exp(-m)
        return m + jnp.log(t)                                     # (tb, 1)

    def accumulate(neg, pos):
        # Single fused expression; (1,1) partial added into the resident output.
        out_ref[...] += jnp.sum(lse_with_zero(neg) + lse_with_zero(pos),
                                keepdims=True)

    # Fast path for fully-valid interior tiles; masked path only for tiles that
    # straddle `batch` (including over-range tiles clamped by the index map,
    # whose rows are all invalid and therefore contribute exactly zero).
    needs_mask = (tile_idx + 1) * tb > batch

    @pl.when(jnp.logical_not(needs_mask))
    def _interior():
        accumulate(y_neg, y_pos)

    @pl.when(needs_mask)
    def _tail():
        row_ids = tile_idx * tb + lax.broadcasted_iota(jnp.int32, (tb, 1), 0)
        row_valid = row_ids < batch                               # (tb, 1)
        accumulate(jnp.where(row_valid, y_neg, -_BIG),
                   jnp.where(row_valid, y_pos, -_BIG))


def multi_label_cce(y_pre: jax.Array, y_true: jax.Array, *, tb: int | None = None,
                    num_partials: int | None = None,
                    vmem_budget_bytes: int = 16 * 1024 * 1024) -> jax.Array:
    """Pallas implementation of MultiLabelCCE.forward -> scalar mean loss."""
    assert y_pre.shape == y_true.shape
    if y_pre.ndim != 2:
        C = y_pre.shape[-1]
        y_pre = y_pre.reshape(-1, C)
        y_true = y_true.reshape(-1, C)
    B, C = y_pre.shape

    ip = jnp.dtype(y_pre.dtype).itemsize
    it = jnp.dtype(y_true.dtype).itemsize
    # Sublane packing multiple: 8 rows (4-byte), 16 (2-byte), 32 (1-byte).
    row_mult = max(32 // ip, 32 // it, 8)

    # Per-row VMEM footprint: double-buffered input DMA buffers for both
    # operands plus ~5 f32 full-tile temporaries (y_pred cast, y_neg, y_pos,
    # exp temp, slack) for the in-kernel working set.
    per_row = 2 * (ip + it) * C + 20 * C
    if tb is None:
        tb = max(row_mult, vmem_budget_bytes // max(per_row, 1))
        # VALU-bound kernel: per-step overhead is amortized by ~512-1024 rows
        # and v7x has only 64 MiB VMEM per TensorCore, so cap at 1024.
        tb = min(tb, 1024)
    b_pad = ((B + row_mult - 1) // row_mult) * row_mult
    tb = min(tb, b_pad)
    tb = max((tb // row_mult) * row_mult, row_mult)

    nblocks = pl.cdiv(B, tb)
    if num_partials is None:
        num_partials = _default_num_partials()
    num_partials = max(1, min(num_partials, nblocks))
    steps = pl.cdiv(nblocks, num_partials)

    # Explicit scoped-VMEM limit covering pipeline buffers + f32 working set,
    # with headroom; kept <= 48 MiB so it fits v7x's 64 MiB physical VMEM.
    vmem_limit_bytes = min(48 * 1024 * 1024,
                           max(32 * 1024 * 1024, int(1.5 * per_row * tb)))

    # Clamp over-range tiles onto the last real block; their rows are fully
    # masked inside the kernel so they contribute exactly zero.
    def idx_map(p, s):
        return (jnp.minimum(p * steps + s, nblocks - 1), 0)

    kernel = functools.partial(_mlcce_kernel, tb=tb, steps=steps, batch=B)

    partials = pl.pallas_call(
        kernel,
        out_shape=jax.ShapeDtypeStruct((num_partials, 1), jnp.float32),
        grid_spec=pltpu.PrefetchScalarGridSpec(
            num_scalar_prefetch=0,
            grid=(num_partials, steps),
            in_specs=[
                pl.BlockSpec((tb, C), idx_map),
                pl.BlockSpec((tb, C), idx_map),
            ],
            out_specs=pl.BlockSpec((1, 1), lambda p, s: (p, 0)),
        ),
        compiler_params=pltpu.CompilerParams(
            dimension_semantics=("parallel", "arbitrary"),
            vmem_limit_bytes=vmem_limit_bytes,
        ),
    )(y_pre, y_true)

    return jnp.sum(partials) / jnp.float32(B)


def _reference(y_pre, y_true):
    yp = (1.0 - 2.0 * y_true) * y_pre
    y_neg = yp - y_true * _BIG
    y_pos = yp - (1.0 - y_true) * _BIG
    zeros = jnp.zeros_like(yp[..., :1])
    y_neg = jnp.concatenate([y_neg, zeros], axis=-1)
    y_pos = jnp.concatenate([y_pos, zeros], axis=-1)
    neg_loss = jax.scipy.special.logsumexp(y_neg, axis=-1)
    pos_loss = jax.scipy.special.logsumexp(y_pos, axis=-1)
    return jnp.mean(neg_loss + pos_loss)


if __name__ == "__main__":
    key = jax.random.PRNGKey(0)
    k_pred, k_true = jax.random.split(key)

    B, C = 16, 128  # small multi-label problem: 16 samples, 128 classes
    y_pre = jax.random.normal(k_pred, (B, C), dtype=jnp.float32) * 3.0
    y_true_f32 = (jax.random.uniform(k_true, (B, C)) < 0.1).astype(jnp.float32)
    # Pass the 0/1 label mask in a narrower dtype to cut HBM traffic.
    y_true_bf16 = y_true_f32.astype(jnp.bfloat16)

    loss = multi_label_cce(y_pre, y_true_bf16)
    loss = jax.block_until_ready(loss)

    ref = _reference(y_pre, y_true_f32)
    assert jnp.allclose(loss, ref, rtol=1e-5, atol=1e-5), (loss, ref)

    print("KERNEL_OK")
</pallas_src>

<mosaic_0001>
module attributes {stable_mosaic.version = 11 : i64} {
  func.func @_mlcce_kernel(%arg0: i32, %arg1: i32, %arg2: memref<16x128xf32, #tpu.memory_space<vmem>>, %arg3: memref<16x128xbf16, #tpu.memory_space<vmem>>, %arg4: memref<1x1xf32, #tpu.memory_space<vmem>>) attributes {dimension_semantics = [#tpu.dimension_semantics<parallel>, #tpu.dimension_semantics<arbitrary>], iteration_bounds = array<i64: 1, 1>, scalar_prefetch = 0 : i64, scratch_operands = 0 : i64, tpu.core_type = #tpu.core_type<tc>, window_params = [{transform_indices = @transform_0, window_bounds = array<i64: 16, 128>}, {transform_indices = @transform_1, window_bounds = array<i64: 16, 128>}, {transform_indices = @transform_2, window_bounds = array<i64: 1, 1>}]} {
    %c0_i32 = arith.constant 0 : i32
    %0 = arith.cmpi eq, %arg1, %c0_i32 : i32
    %1 = arith.extui %0 : i1 to i32
    %c0_i32_0 = arith.constant 0 : i32
    %2 = arith.cmpi ne, %1, %c0_i32_0 : i32
    scf.if %2 {
      %cst_11 = arith.constant 0.000000e+00 : f32
      %23 = vector.broadcast %cst_11 : f32 to vector<1x1xf32>
      %c0_12 = arith.constant 0 : index
      %c0_13 = arith.constant 0 : index
      %24 = vector.load %arg4[%c0_12, %c0_13] : memref<1x1xf32, #tpu.memory_space<vmem>>, vector<1x1xf32>
      tpu.vector_store %arg4[%c0_12, %c0_13], %23 {strides = array<i32>} : memref<1x1xf32, #tpu.memory_space<vmem>>, vector<1x1xf32>,
    } else {
    }
    %c1_i32 = arith.constant 1 : i32
    %3 = arith.muli %arg0, %c1_i32 : i32
    %4 = arith.addi %3, %arg1 : i32
    %c0 = arith.constant 0 : index
    %c0_1 = arith.constant 0 : index
    %5 = vector.load %arg3[%c0, %c0_1] : memref<16x128xbf16, #tpu.memory_space<vmem>>, vector<16x128xbf16>
    %cst = arith.constant 0.000000e+00 : bf16
    %6 = vector.broadcast %cst : bf16 to vector<16x128xbf16>
    %7 = arith.cmpf one, %5, %6 : vector<16x128xbf16>
    %c0_2 = arith.constant 0 : index
    %c0_3 = arith.constant 0 : index
    %8 = vector.load %arg2[%c0_2, %c0_3] : memref<16x128xf32, #tpu.memory_space<vmem>>, vector<16x128xf32>
    %cst_4 = arith.constant -9.99999995E+11 : f32
    %9 = vector.broadcast %cst_4 : f32 to vector<16x128xf32>
    %10 = arith.select %7, %9, %8 : vector<16x128xi1>, vector<16x128xf32>
    %cst_5 = arith.constant 0.000000e+00 : f32
    %11 = vector.broadcast %cst_5 : f32 to vector<16x128xf32>
    %12 = arith.subf %11, %8 : vector<16x128xf32>
    %cst_6 = arith.constant -9.99999995E+11 : f32
    %13 = vector.broadcast %cst_6 : f32 to vector<16x128xf32>
    %14 = arith.select %7, %12, %13 : vector<16x128xi1>, vector<16x128xf32>
    %c1_i32_7 = arith.constant 1 : i32
    %15 = arith.addi %4, %c1_i32_7 : i32
    %c16_i32 = arith.constant 16 : i32
    %16 = arith.muli %15, %c16_i32 : i32
    %c16_i32_8 = arith.constant 16 : i32
    %17 = arith.cmpi sgt, %16, %c16_i32_8 : i32
    %true = arith.constant true
    %18 = arith.xori %17, %true : i1
    %19 = arith.extui %18 : i1 to i32
    %c0_i32_9 = arith.constant 0 : i32
    %20 = arith.cmpi ne, %19, %c0_i32_9 : i32
    scf.if %20 {
      %c0_11 = arith.constant 0 : index
      %c0_12 = arith.constant 0 : index
      %23 = vector.load %arg4[%c0_11, %c0_12] : memref<1x1xf32, #tpu.memory_space<vmem>>, vector<1x1xf32>
      %cst_13 = arith.constant dense<0xFF800000> : vector<16xf32>
      %24 = vector.multi_reduction <maximumf>, %10, %cst_13 [1] : vector<16x128xf32> to vector<16xf32>
      %25 = vector.shape_cast %24 : vector<16xf32> to vector<16x1xf32>
      %cst_14 = arith.constant 0.000000e+00 : f32
      %26 = vector.broadcast %cst_14 : f32 to vector<16x1xf32>
      %27 = arith.maximumf %25, %26 : vector<16x1xf32>
      %28 = vector.broadcast %27 : vector<16x1xf32> to vector<16x128xf32>
      %29 = arith.subf %10, %28 : vector<16x128xf32>
      %30 = math.exp %29 : vector<16x128xf32>
      %cst_15 = arith.constant dense<0.000000e+00> : vector<16xf32>
      %31 = vector.multi_reduction <add>, %30, %cst_15 [1] : vector<16x128xf32> to vector<16xf32>
      %32 = vector.shape_cast %31 : vector<16xf32> to vector<16x1xf32>
      %cst_16 = arith.constant 0.000000e+00 : f32
      %33 = vector.broadcast %cst_16 : f32 to vector<16x1xf32>
      %34 = arith.subf %33, %27 : vector<16x1xf32>
      %35 = math.exp %34 : vector<16x1xf32>
      %36 = arith.addf %32, %35 : vector<16x1xf32>
      %37 = math.log %36 : vector<16x1xf32>
      %38 = arith.addf %27, %37 : vector<16x1xf32>
      %cst_17 = arith.constant dense<0xFF800000> : vector<16xf32>
      %39 = vector.multi_reduction <maximumf>, %14, %cst_17 [1] : vector<16x128xf32> to vector<16xf32>
      %40 = vector.shape_cast %39 : vector<16xf32> to vector<16x1xf32>
      %cst_18 = arith.constant 0.000000e+00 : f32
      %41 = vector.broadcast %cst_18 : f32 to vector<16x1xf32>
      %42 = arith.maximumf %40, %41 : vector<16x1xf32>
      %43 = vector.broadcast %42 : vector<16x1xf32> to vector<16x128xf32>
      %44 = arith.subf %14, %43 : vector<16x128xf32>
      %45 = math.exp %44 : vector<16x128xf32>
      %cst_19 = arith.constant dense<0.000000e+00> : vector<16xf32>
      %46 = vector.multi_reduction <add>, %45, %cst_19 [1] : vector<16x128xf32> to vector<16xf32>
      %47 = vector.shape_cast %46 : vector<16xf32> to vector<16x1xf32>
      %cst_20 = arith.constant 0.000000e+00 : f32
      %48 = vector.broadcast %cst_20 : f32 to vector<16x1xf32>
      %49 = arith.subf %48, %42 : vector<16x1xf32>
      %50 = math.exp %49 : vector<16x1xf32>
      %51 = arith.addf %47, %50 : vector<16x1xf32>
      %52 = math.log %51 : vector<16x1xf32>
      %53 = arith.addf %42, %52 : vector<16x1xf32>
      %54 = arith.addf %38, %53 : vector<16x1xf32>
      %55 = vector.shape_cast %54 : vector<16x1xf32> to vector<1x16x1xf32>
      %cst_21 = arith.constant dense<0.000000e+00> : vector<1xf32>
      %56 = vector.multi_reduction <add>, %55, %cst_21 [1, 2] : vector<1x16x1xf32> to vector<1xf32>
      %57 = vector.shape_cast %56 : vector<1xf32> to vector<1x1x1xf32>
      %58 = vector.extract %57[0, 0, 0] : f32 from vector<1x1x1xf32>
      %59 = vector.broadcast %58 : f32 to vector<1x1xf32>
      %60 = arith.addf %23, %59 : vector<1x1xf32>
      %c0_22 = arith.constant 0 : index
      %c0_23 = arith.constant 0 : index
      %61 = vector.load %arg4[%c0_22, %c0_23] : memref<1x1xf32, #tpu.memory_space<vmem>>, vector<1x1xf32>
      tpu.vector_store %arg4[%c0_22, %c0_23], %60 {strides = array<i32>} : memref<1x1xf32, #tpu.memory_space<vmem>>, vector<1x1xf32>,
    } else {
    }
    %21 = arith.extui %17 : i1 to i32
    %c0_i32_10 = arith.constant 0 : i32
    %22 = arith.cmpi ne, %21, %c0_i32_10 : i32
    scf.if %22 {
      %c16_i32_11 = arith.constant 16 : i32
      %23 = arith.muli %4, %c16_i32_11 : i32
      %24 = tpu.iota {dimensions = array<i32: 0>} : vector<16x1xi32>
      %25 = vector.broadcast %23 : i32 to vector<16x1xi32>
      %26 = arith.addi %25, %24 : vector<16x1xi32>
      %c16_i32_12 = arith.constant 16 : i32
      %27 = vector.broadcast %c16_i32_12 : i32 to vector<16x1xi32>
      %28 = arith.cmpi slt, %26, %27 : vector<16x1xi32>
      %cst_13 = arith.constant -9.99999995E+11 : f32
      %29 = vector.shape_cast %28 : vector<16x1xi1> to vector<16x1xi1>
      %30 = vector.broadcast %29 : vector<16x1xi1> to vector<16x128xi1>
      %31 = vector.broadcast %cst_13 : f32 to vector<16x128xf32>
      %32 = arith.select %30, %10, %31 : vector<16x128xi1>, vector<16x128xf32>
      %cst_14 = arith.constant -9.99999995E+11 : f32
      %33 = vector.shape_cast %28 : vector<16x1xi1> to vector<16x1xi1>
      %34 = vector.broadcast %33 : vector<16x1xi1> to vector<16x128xi1>
      %35 = vector.broadcast %cst_14 : f32 to vector<16x128xf32>
      %36 = arith.select %34, %14, %35 : vector<16x128xi1>, vector<16x128xf32>
      %c0_15 = arith.constant 0 : index
      %c0_16 = arith.constant 0 : index
      %37 = vector.load %arg4[%c0_15, %c0_16] : memref<1x1xf32, #tpu.memory_space<vmem>>, vector<1x1xf32>
      %cst_17 = arith.constant dense<0xFF800000> : vector<16xf32>
      %38 = vector.multi_reduction <maximumf>, %32, %cst_17 [1] : vector<16x128xf32> to vector<16xf32>
      %39 = vector.shape_cast %38 : vector<16xf32> to vector<16x1xf32>
      %cst_18 = arith.constant 0.000000e+00 : f32
      %40 = vector.broadcast %cst_18 : f32 to vector<16x1xf32>
      %41 = arith.maximumf %39, %40 : vector<16x1xf32>
      %42 = vector.broadcast %41 : vector<16x1xf32> to vector<16x128xf32>
      %43 = arith.subf %32, %42 : vector<16x128xf32>
      %44 = math.exp %43 : vector<16x128xf32>
      %cst_19 = arith.constant dense<0.000000e+00> : vector<16xf32>
      %45 = vector.multi_reduction <add>, %44, %cst_19 [1] : vector<16x128xf32> to vector<16xf32>
      %46 = vector.shape_cast %45 : vector<16xf32> to vector<16x1xf32>
      %cst_20 = arith.constant 0.000000e+00 : f32
      %47 = vector.broadcast %cst_20 : f32 to vector<16x1xf32>
      %48 = arith.subf %47, %41 : vector<16x1xf32>
      %49 = math.exp %48 : vector<16x1xf32>
      %50 = arith.addf %46, %49 : vector<16x1xf32>
      %51 = math.log %50 : vector<16x1xf32>
      %52 = arith.addf %41, %51 : vector<16x1xf32>
      %cst_21 = arith.constant dense<0xFF800000> : vector<16xf32>
      %53 = vector.multi_reduction <maximumf>, %36, %cst_21 [1] : vector<16x128xf32> to vector<16xf32>
      %54 = vector.shape_cast %53 : vector<16xf32> to vector<16x1xf32>
      %cst_22 = arith.constant 0.000000e+00 : f32
      %55 = vector.broadcast %cst_22 : f32 to vector<16x1xf32>
      %56 = arith.maximumf %54, %55 : vector<16x1xf32>
      %57 = vector.broadcast %56 : vector<16x1xf32> to vector<16x128xf32>
      %58 = arith.subf %36, %57 : vector<16x128xf32>
      %59 = math.exp %58 : vector<16x128xf32>
      %cst_23 = arith.constant dense<0.000000e+00> : vector<16xf32>
      %60 = vector.multi_reduction <add>, %59, %cst_23 [1] : vector<16x128xf32> to vector<16xf32>
      %61 = vector.shape_cast %60 : vector<16xf32> to vector<16x1xf32>
      %cst_24 = arith.constant 0.000000e+00 : f32
      %62 = vector.broadcast %cst_24 : f32 to vector<16x1xf32>
      %63 = arith.subf %62, %56 : vector<16x1xf32>
      %64 = math.exp %63 : vector<16x1xf32>
      %65 = arith.addf %61, %64 : vector<16x1xf32>
      %66 = math.log %65 : vector<16x1xf32>
      %67 = arith.addf %56, %66 : vector<16x1xf32>
      %68 = arith.addf %52, %67 : vector<16x1xf32>
      %69 = vector.shape_cast %68 : vector<16x1xf32> to vector<1x16x1xf32>
      %cst_25 = arith.constant dense<0.000000e+00> : vector<1xf32>
      %70 = vector.multi_reduction <add>, %69, %cst_25 [1, 2] : vector<1x16x1xf32> to vector<1xf32>
      %71 = vector.shape_cast %70 : vector<1xf32> to vector<1x1x1xf32>
      %72 = vector.extract %71[0, 0, 0] : f32 from vector<1x1x1xf32>
      %73 = vector.broadcast %72 : f32 to vector<1x1xf32>
      %74 = arith.addf %37, %73 : vector<1x1xf32>
      %c0_26 = arith.constant 0 : index
      %c0_27 = arith.constant 0 : index
      %75 = vector.load %arg4[%c0_26, %c0_27] : memref<1x1xf32, #tpu.memory_space<vmem>>, vector<1x1xf32>
      tpu.vector_store %arg4[%c0_26, %c0_27], %74 {strides = array<i32>} : memref<1x1xf32, #tpu.memory_space<vmem>>, vector<1x1xf32>,
    } else {
    }
    return
  }
  func.func @transform_0(%arg0: i32, %arg1: i32) -> (i32, i32) {
    %c1_i32 = arith.constant 1 : i32
    %0 = arith.muli %arg0, %c1_i32 : i32
    %1 = arith.addi %0, %arg1 : i32
    %c0_i32 = arith.constant 0 : i32
    %2 = arith.minsi %1, %c0_i32 : i32
    %c0_i32_0 = arith.constant 0 : i32
    %c0_i32_1 = arith.constant 0 : i32
    return %2, %c0_i32_0 : i32, i32
  }
  func.func @transform_1(%arg0: i32, %arg1: i32) -> (i32, i32) {
    %c1_i32 = arith.constant 1 : i32
    %0 = arith.muli %arg0, %c1_i32 : i32
    %1 = arith.addi %0, %arg1 : i32
    %c0_i32 = arith.constant 0 : i32
    %2 = arith.minsi %1, %c0_i32 : i32
    %c0_i32_0 = arith.constant 0 : i32
    %c0_i32_1 = arith.constant 0 : i32
    return %2, %c0_i32_0 : i32, i32
  }
  func.func @transform_2(%arg0: i32, %arg1: i32) -> (i32, i32) {
    %c0_i32 = arith.constant 0 : i32
    %c0_i32_0 = arith.constant 0 : i32
    return %arg0, %c0_i32 : i32, i32
  }
}

</mosaic_0001>

<bundles_post_ra>
// kernel: tpu_custom_call.1
= control target key start
LH: loop header
LB: loop body
LE: loop exit
PB: predicated region body
PF: predicated region fallthrough
CT: control target
= control target key end

     0   :  { %7 = vsyncpa [#allocation3], 0  ;;  %s444_s0 = inlined_call_operand.hbm [shape: f32[16,128], index: 0, kind: input, shape index: {}]   ;;  %s445_s1 = inlined_call_operand.hbm [shape: bf16[16,128], index: 1, kind: input, shape index: {}]   ;;  %s446_s2 = inlined_call_operand.hbm [shape: f32[1,1], index: 2, kind: output, shape index: {}]  }
   0x1   :  { %8 = vsyncpa [#allocation6], 0 }
   0x2   :  { %9 = vsyncpa [#allocation4], 0  ;;  %s20_s11 = sshll.u32 %s444_s0, 4  ;;  %s410_s12 = smov [#allocation2]   ;;  %s21_s11 = int_to_ptr.hbm [resolvable:$true] %s20_s11 }
   0x3   :  { %s22_s13 = sshll.u32 %s410_s12, 4  ;;  %s39_s16 = sshll.u32 %s445_s1, 4  ;;  %s23_s13 = int_to_ptr.vmem [resolvable:$true] %s22_s13  ;;  %s40_s16 = int_to_ptr.hbm [resolvable:$true] %s39_s16 }
   0x4   :  { %s411_s17 = smov 128   ;;  %s412_s18 = smov 8  }
   0x5   :  { %28 = dma.hbm_to_vmem [thread:$0]  %s21_s11, 256, %s23_s13, [#allocation3], %s411_s17, %s411_s17, %s412_s18  }
   0x6   :  { %s413_s19 = smov [#allocation5]   ;;  %s414_s21 = smov 64  }
   0x7   :  { %s41_s20 = sshll.u32 %s413_s19, 4  ;;  %s415_s22 = smov 4   ;;  %s42_s20 = int_to_ptr.vmem [resolvable:$true] %s41_s20 }
   0x8   :  { %47 = dma.hbm_to_vmem [thread:$0]  %s40_s16, 128, %s42_s20, [#allocation6], %s414_s21, %s414_s21, %s415_s22  }
   0x9   :  { %404 = dma.done.wait [#allocation3], 256  }
   0xa   :  { %405 = vsyncadd [#allocation3], 4294967040 }
   0xb   :  { %406 = dma.done.wait [#allocation6], 128  }
   0xc   :  { %407 = vsyncadd [#allocation6], 4294967168  ;;  %vm68_vm0 = vcmask 0   ;;  %v416_v0 = vmov 0.0   ;;  %v295_v1 = vld [vmem:[#allocation5] sm:$0xff]   ;;  %v77_v2 = vld [vmem:[#allocation2] sm:$0xff] }
   0xd   :  { %69 = vst.msk [vmem:[#allocation7] sm:$0x1] %vm68_vm0, %v416_v0  ;;  %v296_v3 = vunpack.c.l.bf16 %v295_v1  ;;  %v81_v4 = vsub.f32 0.0, %v77_v2  ;;  %v297_v5 = vunpack.c.h.bf16 %v295_v1  ;;  %v78_v6 = vld [vmem:[#allocation2 + $0x8] sm:$0xff]  ;;  %vm155_vm3 = vcmask 7168   ;;  %s417_s0 = smov [#allocation7]  }
   0xe   :  { %v82_v9 = vsub.f32 0.0, %v78_v6  ;;  %s277_s1 = sshll.u32 %s417_s0, 4  ;;  %s279_s25 = sshll.u32 %s446_s2, 4  ;;  %s278_s1 = int_to_ptr.vmem [resolvable:$true] %s277_s1  ;;  %s280_s25 = int_to_ptr.hbm [resolvable:$true] %s279_s25 }
   0xf   :  { %vm75_vm1 = vcmp.ne.f32.partialorder %v296_v3, 0.0  ;;  %vm76_vm2 = vcmp.ne.f32.partialorder %v297_v5, 0.0 }
  0x10   :  { %v83_v7 = vsel %vm75_vm1, %v81_v4, -1e+12  ;;  %v79_v8 = vsel %vm75_vm1, -1e+12, %v77_v2  ;;  %v84_v10 = vsel %vm76_vm2, %v82_v9, -1e+12 }
  0x11   :  { %123 = vmax.xlane.f32.xlu1 %v83_v7  ;;  %93 = vmax.xlane.f32.xlu0 %v79_v8  ;;  %v80_v11 = vsel %vm76_vm2, -1e+12, %v78_v6 }
  0x19   :  { %125 = vmax.xlane.f32.xlu1 %v84_v10  ;;  %95 = vmax.xlane.f32.xlu0 %v80_v11 }
  0x84   :  { %v124_v12 = vpop.xlane.xlu1 %123  ;;  %v94_v13 = vpop.xlane.xlu0 %93 }
  0x85   :  { %v127_v14 = vmax.f32 %v124_v12, 0.0  ;;  %v97_v15 = vmax.f32 %v94_v13, 0.0  ;;  %v92_v12 = vld [vmem:[#allocation7] sm:$0x1] }
  0x87   :  { %v129_v16 = vsub.f32 %v83_v7, %v127_v14  ;;  %v99_v17 = vsub.f32 %v79_v8, %v97_v15  ;;  %v139_v32 = vsub.f32 0.0, %v127_v14  ;;  %v109_v33 = vsub.f32 0.0, %v97_v15 }
  0x89   :  { %v131_v18 = vmul.f32 1.442695, %v129_v16  ;;  %v101_v19 = vmul.f32 1.442695, %v99_v17  ;;  %v141_v34 = vmul.f32 1.442695, %v139_v32 }
  0x8a   :  { %v111_v35 = vmul.f32 1.442695, %v109_v33 }
  0x8b   :  { %308 = vpow2.f32 %v131_v18 }
  0x8c   :  { %v126_v20 = vpop.xlane.xlu1 %125  ;;  %v96_v21 = vpop.xlane.xlu0 %95  ;;  %310 = vpow2.f32 %v101_v19 }
  0x8d   :  { %v128_v22 = vmax.f32 %v126_v20, 0.0  ;;  %v98_v23 = vmax.f32 %v96_v21, 0.0 }
  0x8f   :  { %v130_v24 = vsub.f32 %v84_v10, %v128_v22  ;;  %v100_v25 = vsub.f32 %v80_v11, %v98_v23  ;;  %v140_v36 = vsub.f32 0.0, %v128_v22  ;;  %v110_v37 = vsub.f32 0.0, %v98_v23 }
  0x91   :  { %v309_v26 = vpop.eup %308  ;;  %v133_v27 = vmul.f32 1.442695, %v130_v24  ;;  %v103_v28 = vmul.f32 1.442695, %v100_v25  ;;  %v143_v38 = vmul.f32 1.442695, %v140_v36 }
  0x92   :  { %135 = vadd.xlane.f32.xlu0 %v309_v26  ;;  %v311_v29 = vpop.eup %310  ;;  %v113_v40 = vmul.f32 1.442695, %v110_v37 }
  0x93   :  { %312 = vpow2.f32 %v133_v27  ;;  %105 = vadd.xlane.f32.xlu2 %v311_v29 }
  0x94   :  { %314 = vpow2.f32 %v103_v28 }
  0x95   :  { %316 = vpow2.f32 %v141_v34 }
  0x96   :  { %318 = vpow2.f32 %v111_v35 }
  0x97   :  { %320 = vpow2.f32 %v143_v38 }
  0x98   :  { %322 = vpow2.f32 %v113_v40 }
  0x99   :  { %v313_v30 = vpop.eup %312 }
  0x9a   :  { %137 = vadd.xlane.f32.xlu1 %v313_v30  ;;  %v315_v31 = vpop.eup %314 }
  0x9b   :  { %107 = vadd.xlane.f32.xlu2 %v315_v31  ;;  %v317_v39 = vpop.eup %316 }
  0x9c   :  { %v319_v43 = vpop.eup %318 }
  0x9d   :  { %v321_v46 = vpop.eup %320 }
  0x9e   :  { %v323_v49 = vpop.eup %322 }
 0x105   :  { %v136_v41 = vpop.xlane.xlu0 %135 }
 0x106   :  { %v145_v42 = vadd.f32 %v317_v39, %v136_v41  ;;  %v106_v44 = vpop.xlane.xlu2 %105 }
 0x107   :  { %v115_v45 = vadd.f32 %v319_v43, %v106_v44 }
 0x108   :  { %324 = vlog2.f32 %v145_v42 }
 0x109   :  { %326 = vlog2.f32 %v115_v45 }
 0x10d   :  { %v138_v47 = vpop.xlane.xlu1 %137 }
 0x10e   :  { %v146_v48 = vadd.f32 %v321_v46, %v138_v47  ;;  %v325_v50 = vpop.eup %324  ;;  %v108_v51 = vpop.xlane.xlu2 %107 }
 0x10f   :  { %v327_v52 = vpop.eup %326  ;;  %v116_v53 = vadd.f32 %v323_v49, %v108_v51  ;;  %v148_v55 = vmul.f32 0.6931472, %v325_v50 }
 0x110   :  { %328 = vlog2.f32 %v146_v48  ;;  %v118_v54 = vmul.f32 0.6931472, %v327_v52 }
 0x111   :  { %330 = vlog2.f32 %v116_v53  ;;  %v151_v59 = vadd.f32 %v148_v55, %v127_v14 }
 0x112   :  { %v121_v58 = vadd.f32 %v118_v54, %v97_v15 }
 0x114   :  { %v153_v0 = vadd.f32 %v151_v59, %v121_v58 }
 0x116   :  { %v329_v56 = vpop.eup %328  ;;  %v156_v2 = vsel %vm155_vm3, %v153_v0, 0.0 }
 0x117   :  { %v150_v57 = vmul.f32 0.6931472, %v329_v56  ;;  %v331_v60 = vpop.eup %330 }
 0x118   :  { %v120_v62 = vmul.f32 0.6931472, %v331_v60 }
 0x119   :  { %v152_v61 = vadd.f32 %v150_v57, %v128_v22 }
 0x11a   :  { %v122_v63 = vadd.f32 %v120_v62, %v98_v23 }
 0x11c   :  { %v154_v1 = vadd.f32 %v152_v61, %v122_v63 }
 0x11e   :  { %v157_v3 = vsel %vm155_vm3, %v154_v1, 0.0 }
 0x11f   :  { %v158_v4 = vadd.f32 %v157_v3, %v156_v2 }
 0x121   :  { %159 = vadd.xlane.f32.xlu2 %v158_v4 }
 0x194   :  { %v160_v5 = vpop.xlane.xlu2 %159 }
 0x195   :  { %v161_v6 = vrot.slane %v160_v5, 4 }
 0x197   :  { %v162_v7 = vadd.f32 %v161_v6, %v160_v5 }
 0x199   :  { %v163_v8 = vrot.slane %v162_v7, 2 }
 0x19b   :  { %v164_v9 = vadd.f32 %v163_v8, %v162_v7 }
 0x19d   :  { %v165_v10 = vrot.slane %v164_v9, 1 }
 0x19f   :  { %v166_v11 = vadd.f32 %v165_v10, %v164_v9 }
 0x1a1   :  { %298 = vpush %v166_v11 }
 0x1d2   :  { %s299_s26 = spop %298 }
 0x1d3   :  { %v168_v13 = vstv %s299_s26 }
 0x1d4   :  { %v169_v14 = vadd.f32 %v168_v13, %v92_v12 }
 0x1d6   :  { %171 = vst.msk [vmem:[#allocation7] sm:$0x1] %vm68_vm0, %v169_v14 }
 0x1d7   :  { %282 = dma.vmem_to_hbm [thread:$0]  %s278_s1, 16, %s280_s25, [#allocation4]  }
 0x1d8   :  { %408 = dma.done.wait [#allocation4], 16  }
 0x1d9   :  { %409 = vsyncadd [#allocation4], 4294967280 }
 0x1da   :  { %287 = vsyncpa [#allocation3], 1 }
 0x1db   :  { %288 = vsyncpa [#allocation6], 1 }
 0x1dc   :  { %289 = vsyncpa [#allocation4], 1 }

</bundles_post_ra>
